<compile_context>
chip_gen: v7x
topology: tpu7x:2x2x1
jax: 0.10.0
libtpu: 0.0.40
codegen_flags: <defaults>
</compile_context>

<pallas_src>
import functools

import jax
import jax.numpy as jnp
from jax import lax
from jax.experimental import pallas as pl
from jax.experimental.pallas import tpu as pltpu


def _round_up(x, m):
    return (x + m - 1) // m * m


def _cdiv(a, b):
    return -(-a // b)


def _sublane_multiple(dtype):
    # min second-to-last tile dim for the output dtype
    return {4: 8, 2: 16, 1: 32}.get(jnp.dtype(dtype).itemsize, 8)


def _hw_config():
    """Best-effort generation detection for VMEM / core-count aware tiling."""
    kind = ""
    try:
        kind = jax.devices()[0].device_kind.lower()
    except Exception:
        pass
    if "v7" in kind or "tpu7" in kind:
        return {"name": "v7x", "vmem": 64 << 20, "cores": 2}
    if "v6" in kind:
        return {"name": "v6e", "vmem": 128 << 20, "cores": 1}
    if "v5" in kind:
        return {"name": "v5e", "vmem": 128 << 20, "cores": 1}
    # Unknown -> conservative (v7x-like) assumptions.
    return {"name": "unknown", "vmem": 64 << 20, "cores": 2}


def _vmem_needed(tb, vocab, d_pad, emb_isz, out_isz, mm_isz):
    table = vocab * d_pad * emb_isz           # single-buffered resident table
    affine = 2 * d_pad * emb_isz              # gamma + beta
    ids_buf = 2 * tb * 4                      # double-buffered ids column
    out_buf = 2 * tb * d_pad * out_isz        # double-buffered output tile
    one_hot = tb * vocab * mm_isz             # (TB, V) one-hot
    interm = 4 * tb * d_pad * 4               # live f32 intermediates
    return table + affine + ids_buf + out_buf + one_hot + interm


def _cve_kernel(ids_ref, emb_ref, gamma_ref, beta_ref, out_ref, *, eps, d_real):
    """One grid step: gather TB rows via one-hot MXU matmul, then LayerNorm."""
    tb = out_ref.shape[0]
    vocab = emb_ref.shape[0]

    # ---- gather: (TB, V) one-hot x (V, D_pad) table -> (TB, D_pad) rows -----
    ids = ids_ref[...]                                        # (TB, 1) int32
    iota_v = lax.broadcasted_iota(jnp.int32, (tb, vocab), 1)  # (TB, V)
    emb = emb_ref[...]
    if jnp.issubdtype(emb.dtype, jnp.floating):
        # native-dtype MXU inputs; exact because one_hot is 0/1 and acc is f32.
        one_hot = (iota_v == ids).astype(emb.dtype)
        rows = jnp.dot(one_hot, emb, preferred_element_type=jnp.float32)
    else:
        one_hot = (iota_v == ids).astype(jnp.float32)
        rows = jnp.dot(one_hot, emb.astype(jnp.float32),
                       preferred_element_type=jnp.float32)    # (TB, D_pad) f32

    # ---- block-vectorized LayerNorm (real D only; padded cols are zero) -----
    inv_d = jnp.float32(1.0 / d_real)
    s1 = jnp.sum(rows, axis=-1, keepdims=True)                # XLU reduce
    s2 = jnp.sum(rows * rows, axis=-1, keepdims=True)         # XLU reduce (indep.)
    mean = s1 * inv_d
    var = jnp.maximum(s2 * inv_d - mean * mean, 0.0)
    norm = (rows - mean) * lax.rsqrt(var + eps)

    gamma = gamma_ref[...].astype(jnp.float32)                # (1, D_pad)
    beta = beta_ref[...].astype(jnp.float32)                  # (1, D_pad)
    out_ref[...] = (norm * gamma + beta).astype(out_ref.dtype)


def category_value_encoder(ids, emb_table, gamma, beta, *, eps=1e-5,
                           token_block=None):
    """Pallas equivalent of: LayerNorm(Embedding(ids)).  ids: (B, S) ints."""
    B, S = ids.shape
    V, D = emb_table.shape
    N = B * S
    out_dtype = emb_table.dtype
    hw = _hw_config()

    # ---- lane-pad D to a multiple of 128 (lane-dense unmasked stores) -------
    D_pad = _round_up(D, 128)
    if D_pad != D:
        emb_p = jnp.pad(emb_table, ((0, 0), (0, D_pad - D)))
        gamma2 = jnp.pad(gamma.reshape(1, D), ((0, 0), (0, D_pad - D)))
        beta2 = jnp.pad(beta.reshape(1, D), ((0, 0), (0, D_pad - D)))
    else:
        emb_p = emb_table
        gamma2 = gamma.reshape(1, D)
        beta2 = beta.reshape(1, D)

    emb_isz = jnp.dtype(emb_p.dtype).itemsize
    out_isz = jnp.dtype(out_dtype).itemsize
    mm_isz = emb_isz if jnp.issubdtype(emb_p.dtype, jnp.floating) else 4

    # ---- generation-aware token block ---------------------------------------
    if token_block is None:
        if hw["name"] in ("v6e", "v5e") and D_pad <= 256:
            token_block = 1024
        elif hw["name"] in ("v7x", "unknown"):
            token_block = 256 if D_pad > 256 else 512
        else:
            token_block = 512

    sub = _sublane_multiple(out_dtype)
    n_rounded = _round_up(N, sub)
    tb = min(_round_up(token_block, sub), n_rounded)

    # shrink tb until the VMEM budget (with headroom) is met
    budget = (hw["vmem"] * 3) // 4
    while tb > sub and _vmem_needed(tb, V, D_pad, emb_isz, out_isz, mm_isz) > budget:
        tb = max(sub, _round_up(tb // 2, sub))

    # on multi-TC chips, make sure the parallel grid axis has >= cores blocks
    if hw["cores"] > 1:
        if (_round_up(N, tb) // tb) < hw["cores"] and n_rounded >= hw["cores"] * sub:
            tb = min(tb, _round_up(_cdiv(N, hw["cores"]), sub))

    n_pad = _round_up(N, tb)
    num_blocks = n_pad // tb

    needed = _vmem_needed(tb, V, D_pad, emb_isz, out_isz, mm_isz)
    vmem_limit = int(min((hw["vmem"] * 3) // 4,
                         max(needed * 2 + (4 << 20), 32 << 20)))

    # ---- operands ------------------------------------------------------------
    flat_ids = ids.reshape(N).astype(jnp.int32)
    if n_pad != N:
        flat_ids = jnp.pad(flat_ids, (0, n_pad - N))   # pad with id 0 (valid row)
    ids_col = flat_ids.reshape(n_pad, 1)               # (Np, 1): last dim == full dim

    def _build(single_buffer_consts):
        if single_buffer_consts:
            const_kw = {"pipeline_mode": pl.Buffered(1)}
        else:
            const_kw = {}
        in_specs = [
            # ids: (TB, 1) block streamed through VMEM.
            pl.BlockSpec((tb, 1), lambda i: (i, 0)),
            # full table resident in VMEM; constant index_map => no re-DMA.
            pl.BlockSpec((V, D_pad), lambda i: (0, 0), **const_kw),
            pl.BlockSpec((1, D_pad), lambda i: (0, 0), **const_kw),
            pl.BlockSpec((1, D_pad), lambda i: (0, 0), **const_kw),
        ]
        return pl.pallas_call(
            functools.partial(_cve_kernel, eps=eps, d_real=D),
            out_shape=jax.ShapeDtypeStruct((n_pad, D_pad), out_dtype),
            grid_spec=pltpu.PrefetchScalarGridSpec(
                num_scalar_prefetch=0,
                grid=(num_blocks,),
                in_specs=in_specs,
                out_specs=pl.BlockSpec((tb, D_pad), lambda i: (i, 0)),
            ),
            compiler_params=pltpu.CompilerParams(
                dimension_semantics=("parallel",),   # token axis shards across TCs
                vmem_limit_bytes=vmem_limit),
        )

    try:
        out = _build(True)(ids_col, emb_p, gamma2, beta2)
    except Exception:
        # fallback if this JAX build rejects pipeline_mode=pl.Buffered(1)
        out = _build(False)(ids_col, emb_p, gamma2, beta2)

    return out[:N, :D].reshape(B, S, D)


def _reference(ids, emb_table, gamma, beta, eps=1e-5):
    e = emb_table[ids].astype(jnp.float32)
    mean = e.mean(-1, keepdims=True)
    var = ((e - mean) ** 2).mean(-1, keepdims=True)
    y = (e - mean) / jnp.sqrt(var + eps)
    y = y * gamma.astype(jnp.float32) + beta.astype(jnp.float32)
    return y.astype(emb_table.dtype)


if __name__ == "__main__":
    key = jax.random.PRNGKey(0)
    k_emb, k_ids, k_g, k_b, k_ids2, k_emb2, k_ids3 = jax.random.split(key, 7)

    # Small shapes consistent with the module's forward.
    B, S = 2, 8          # batch, sequence of category ids
    V, D = 32, 128       # num_embeddings, embedding_dim
    padding_idx = 0

    # nn.Embedding ~ N(0,1) with padding row zeroed; LayerNorm affine params
    # randomized (defaults are weight=1, bias=0) for a stronger check.
    emb_table = jax.random.normal(k_emb, (V, D), dtype=jnp.float32)
    emb_table = emb_table.at[padding_idx].set(0.0)
    gamma = 1.0 + 0.1 * jax.random.normal(k_g, (D,), dtype=jnp.float32)
    beta = 0.1 * jax.random.normal(k_b, (D,), dtype=jnp.float32)

    x = jax.random.randint(k_ids, (B, S), 0, V, dtype=jnp.int32)

    # --- primary check (f32) -------------------------------------------------
    y = jax.block_until_ready(category_value_encoder(x, emb_table, gamma, beta))
    ref = _reference(x, emb_table, gamma, beta)
    assert y.shape == (B, S, D)
    assert jnp.allclose(y, ref, atol=1e-4, rtol=1e-4)

    # --- multi-block grid + ragged token count (padding path) ---------------
    x2 = jax.random.randint(k_ids2, (3, 7), 0, V, dtype=jnp.int32)  # N=21 -> pad
    y2 = jax.block_until_ready(
        category_value_encoder(x2, emb_table, gamma, beta, token_block=8))
    assert jnp.allclose(y2, _reference(x2, emb_table, gamma, beta),
                        atol=1e-4, rtol=1e-4)

    # --- bf16 table/output: native-dtype MXU gather + 16-row sublane tiles ---
    emb_bf16 = emb_table.astype(jnp.bfloat16)
    g_bf16 = gamma.astype(jnp.bfloat16)
    b_bf16 = beta.astype(jnp.bfloat16)
    y3 = jax.block_until_ready(
        category_value_encoder(x, emb_bf16, g_bf16, b_bf16))
    ref3 = _reference(x, emb_bf16, g_bf16, b_bf16)
    assert jnp.allclose(y3.astype(jnp.float32), ref3.astype(jnp.float32),
                        atol=3e-2, rtol=3e-2)

    # --- non-lane-aligned D (exercises D padding to 128 + real-D LayerNorm) --
    V4, D4 = 16, 80
    emb4 = jax.random.normal(k_emb2, (V4, D4), dtype=jnp.float32)
    g4 = 1.0 + 0.1 * jax.random.normal(k_g, (D4,), dtype=jnp.float32)
    b4 = 0.1 * jax.random.normal(k_b, (D4,), dtype=jnp.float32)
    x4 = jax.random.randint(k_ids3, (2, 5), 0, V4, dtype=jnp.int32)
    y4 = jax.block_until_ready(category_value_encoder(x4, emb4, g4, b4))
    assert y4.shape == (2, 5, D4)
    assert jnp.allclose(y4, _reference(x4, emb4, g4, b4), atol=1e-4, rtol=1e-4)

    print("KERNEL_OK")
</pallas_src>

<mosaic_0001>
module attributes {stable_mosaic.version = 11 : i64} {
  func.func @_cve_kernel(%arg0: i32, %arg1: memref<8x1xi32, #tpu.memory_space<vmem>>, %arg2: memref<32x128xf32, #tpu.memory_space<vmem>>, %arg3: memref<1x128xf32, #tpu.memory_space<vmem>>, %arg4: memref<1x128xf32, #tpu.memory_space<vmem>>, %arg5: memref<8x128xf32, #tpu.memory_space<vmem>>) attributes {dimension_semantics = [#tpu.dimension_semantics<parallel>], iteration_bounds = array<i64: 2>, scalar_prefetch = 0 : i64, scratch_operands = 0 : i64, tpu.core_type = #tpu.core_type<tc>, window_params = [{transform_indices = @transform_0, window_bounds = array<i64: 8, 1>}, {pipeline_mode = #tpu.pipeline_mode<synchronous>, transform_indices = @transform_1, window_bounds = array<i64: 32, 128>}, {pipeline_mode = #tpu.pipeline_mode<synchronous>, transform_indices = @transform_2, window_bounds = array<i64: 1, 128>}, {pipeline_mode = #tpu.pipeline_mode<synchronous>, transform_indices = @transform_3, window_bounds = array<i64: 1, 128>}, {transform_indices = @transform_4, window_bounds = array<i64: 8, 128>}]} {
    %c0 = arith.constant 0 : index
    %c0_0 = arith.constant 0 : index
    %0 = vector.load %arg1[%c0, %c0_0] : memref<8x1xi32, #tpu.memory_space<vmem>>, vector<8x1xi32>
    %1 = tpu.iota {dimensions = array<i32: 1>} : vector<8x32xi32>
    %c0_1 = arith.constant 0 : index
    %c0_2 = arith.constant 0 : index
    %2 = vector.load %arg2[%c0_1, %c0_2] : memref<32x128xf32, #tpu.memory_space<vmem>>, vector<32x128xf32>
    %3 = vector.broadcast %0 : vector<8x1xi32> to vector<8x32xi32>
    %4 = arith.cmpi eq, %1, %3 : vector<8x32xi32>
    %5 = arith.extui %4 : vector<8x32xi1> to vector<8x32xi32>
    %6 = arith.sitofp %5 : vector<8x32xi32> to vector<8x32xf32>
    %cst = arith.constant dense<0.000000e+00> : vector<8x128xf32>
    %7 = tpu.matmul %6, %2, %cst {dimension_numbers = #tpu.dot_dimension_numbers<[1], [0], [0], [1], [0, 0, 1, 1], [], []>} : vector<8x32xf32>, vector<32x128xf32>, vector<8x128xf32> -> vector<8x128xf32>
    %cst_3 = arith.constant dense<0.000000e+00> : vector<8xf32>
    %8 = vector.multi_reduction <add>, %7, %cst_3 [1] : vector<8x128xf32> to vector<8xf32>
    %9 = vector.shape_cast %8 : vector<8xf32> to vector<8x1xf32>
    %10 = arith.mulf %7, %7 : vector<8x128xf32>
    %cst_4 = arith.constant dense<0.000000e+00> : vector<8xf32>
    %11 = vector.multi_reduction <add>, %10, %cst_4 [1] : vector<8x128xf32> to vector<8xf32>
    %12 = vector.shape_cast %11 : vector<8xf32> to vector<8x1xf32>
    %cst_5 = arith.constant 7.812500e-03 : f32
    %13 = vector.broadcast %cst_5 : f32 to vector<8x1xf32>
    %14 = arith.mulf %9, %13 : vector<8x1xf32>
    %cst_6 = arith.constant 7.812500e-03 : f32
    %15 = vector.broadcast %cst_6 : f32 to vector<8x1xf32>
    %16 = arith.mulf %12, %15 : vector<8x1xf32>
    %17 = arith.mulf %14, %14 : vector<8x1xf32>
    %18 = arith.subf %16, %17 : vector<8x1xf32>
    %cst_7 = arith.constant 0.000000e+00 : f32
    %19 = vector.broadcast %cst_7 : f32 to vector<8x1xf32>
    %20 = arith.maximumf %18, %19 : vector<8x1xf32>
    %21 = vector.broadcast %14 : vector<8x1xf32> to vector<8x128xf32>
    %22 = arith.subf %7, %21 : vector<8x128xf32>
    %cst_8 = arith.constant 9.99999974E-6 : f32
    %23 = vector.broadcast %cst_8 : f32 to vector<8x1xf32>
    %24 = arith.addf %20, %23 : vector<8x1xf32>
    %25 = math.rsqrt %24 : vector<8x1xf32>
    %26 = vector.broadcast %25 : vector<8x1xf32> to vector<8x128xf32>
    %27 = arith.mulf %22, %26 : vector<8x128xf32>
    %c0_9 = arith.constant 0 : index
    %c0_10 = arith.constant 0 : index
    %28 = vector.load %arg3[%c0_9, %c0_10] : memref<1x128xf32, #tpu.memory_space<vmem>>, vector<1x128xf32>
    %c0_11 = arith.constant 0 : index
    %c0_12 = arith.constant 0 : index
    %29 = vector.load %arg4[%c0_11, %c0_12] : memref<1x128xf32, #tpu.memory_space<vmem>>, vector<1x128xf32>
    %30 = vector.broadcast %28 : vector<1x128xf32> to vector<8x128xf32>
    %31 = arith.mulf %27, %30 : vector<8x128xf32>
    %32 = vector.broadcast %29 : vector<1x128xf32> to vector<8x128xf32>
    %33 = arith.addf %31, %32 : vector<8x128xf32>
    %c0_13 = arith.constant 0 : index
    %c0_14 = arith.constant 0 : index
    %34 = vector.load %arg5[%c0_13, %c0_14] : memref<8x128xf32, #tpu.memory_space<vmem>>, vector<8x128xf32>
    tpu.vector_store %arg5[%c0_13, %c0_14], %33 {strides = array<i32>} : memref<8x128xf32, #tpu.memory_space<vmem>>, vector<8x128xf32>,
    return
  }
  func.func @transform_0(%arg0: i32) -> (i32, i32) {
    %c0_i32 = arith.constant 0 : i32
    %c0_i32_0 = arith.constant 0 : i32
    return %arg0, %c0_i32 : i32, i32
  }
  func.func @transform_1(%arg0: i32) -> (i32, i32) {
    %c0_i32 = arith.constant 0 : i32
    %c0_i32_0 = arith.constant 0 : i32
    %c0_i32_1 = arith.constant 0 : i32
    return %c0_i32, %c0_i32_0 : i32, i32
  }
  func.func @transform_2(%arg0: i32) -> (i32, i32) {
    %c0_i32 = arith.constant 0 : i32
    %c0_i32_0 = arith.constant 0 : i32
    %c0_i32_1 = arith.constant 0 : i32
    return %c0_i32, %c0_i32_0 : i32, i32
  }
  func.func @transform_3(%arg0: i32) -> (i32, i32) {
    %c0_i32 = arith.constant 0 : i32
    %c0_i32_0 = arith.constant 0 : i32
    %c0_i32_1 = arith.constant 0 : i32
    return %c0_i32, %c0_i32_0 : i32, i32
  }
  func.func @transform_4(%arg0: i32) -> (i32, i32) {
    %c0_i32 = arith.constant 0 : i32
    %c0_i32_0 = arith.constant 0 : i32
    return %arg0, %c0_i32 : i32, i32
  }
}

module attributes {stable_mosaic.version = 11 : i64} {
  func.func @_cve_kernel(%arg0: i32, %arg1: memref<8x1xi32, #tpu.memory_space<vmem>>, %arg2: memref<32x128xf32, #tpu.memory_space<vmem>>, %arg3: memref<1x128xf32, #tpu.memory_space<vmem>>, %arg4: memref<1x128xf32, #tpu.memory_space<vmem>>, %arg5: memref<8x128xf32, #tpu.memory_space<vmem>>) attributes {dimension_semantics = [#tpu.dimension_semantics<parallel>], iteration_bounds = array<i64: 2>, scalar_prefetch = 0 : i64, scratch_operands = 0 : i64, tpu.core_type = #tpu.core_type<tc>, window_params = [{transform_indices = @transform_0, window_bounds = array<i64: 8, 1>}, {pipeline_mode = #tpu.pipeline_mode<synchronous>, transform_indices = @transform_1, window_bounds = array<i64: 32, 128>}, {pipeline_mode = #tpu.pipeline_mode<synchronous>, transform_indices = @transform_2, window_bounds = array<i64: 1, 128>}, {pipeline_mode = #tpu.pipeline_mode<synchronous>, transform_indices = @transform_3, window_bounds = array<i64: 1, 128>}, {transform_indices = @transform_4, window_bounds = array<i64: 8, 128>}]} {
    %c0 = arith.constant 0 : index
    %c0_0 = arith.constant 0 : index
    %0 = vector.load %arg1[%c0, %c0_0] : memref<8x1xi32, #tpu.memory_space<vmem>>, vector<8x1xi32>
    %1 = tpu.iota {dimensions = array<i32: 1>} : vector<8x32xi32>
    %c0_1 = arith.constant 0 : index
    %c0_2 = arith.constant 0 : index
    %2 = vector.load %arg2[%c0_1, %c0_2] : memref<32x128xf32, #tpu.memory_space<vmem>>, vector<32x128xf32>
    %3 = vector.broadcast %0 : vector<8x1xi32> to vector<8x32xi32>
    %4 = arith.cmpi eq, %1, %3 : vector<8x32xi32>
    %5 = arith.extui %4 : vector<8x32xi1> to vector<8x32xi32>
    %6 = arith.sitofp %5 : vector<8x32xi32> to vector<8x32xf32>
    %cst = arith.constant dense<0.000000e+00> : vector<8x128xf32>
    %7 = tpu.matmul %6, %2, %cst {dimension_numbers = #tpu.dot_dimension_numbers<[1], [0], [0], [1], [0, 0, 1, 1], [], []>} : vector<8x32xf32>, vector<32x128xf32>, vector<8x128xf32> -> vector<8x128xf32>
    %cst_3 = arith.constant dense<0.000000e+00> : vector<8xf32>
    %8 = vector.multi_reduction <add>, %7, %cst_3 [1] : vector<8x128xf32> to vector<8xf32>
    %9 = vector.shape_cast %8 : vector<8xf32> to vector<8x1xf32>
    %10 = arith.mulf %7, %7 : vector<8x128xf32>
    %cst_4 = arith.constant dense<0.000000e+00> : vector<8xf32>
    %11 = vector.multi_reduction <add>, %10, %cst_4 [1] : vector<8x128xf32> to vector<8xf32>
    %12 = vector.shape_cast %11 : vector<8xf32> to vector<8x1xf32>
    %cst_5 = arith.constant 7.812500e-03 : f32
    %13 = vector.broadcast %cst_5 : f32 to vector<8x1xf32>
    %14 = arith.mulf %9, %13 : vector<8x1xf32>
    %cst_6 = arith.constant 7.812500e-03 : f32
    %15 = vector.broadcast %cst_6 : f32 to vector<8x1xf32>
    %16 = arith.mulf %12, %15 : vector<8x1xf32>
    %17 = arith.mulf %14, %14 : vector<8x1xf32>
    %18 = arith.subf %16, %17 : vector<8x1xf32>
    %cst_7 = arith.constant 0.000000e+00 : f32
    %19 = vector.broadcast %cst_7 : f32 to vector<8x1xf32>
    %20 = arith.maximumf %18, %19 : vector<8x1xf32>
    %21 = vector.broadcast %14 : vector<8x1xf32> to vector<8x128xf32>
    %22 = arith.subf %7, %21 : vector<8x128xf32>
    %cst_8 = arith.constant 9.99999974E-6 : f32
    %23 = vector.broadcast %cst_8 : f32 to vector<8x1xf32>
    %24 = arith.addf %20, %23 : vector<8x1xf32>
    %25 = math.rsqrt %24 : vector<8x1xf32>
    %26 = vector.broadcast %25 : vector<8x1xf32> to vector<8x128xf32>
    %27 = arith.mulf %22, %26 : vector<8x128xf32>
    %c0_9 = arith.constant 0 : index
    %c0_10 = arith.constant 0 : index
    %28 = vector.load %arg3[%c0_9, %c0_10] : memref<1x128xf32, #tpu.memory_space<vmem>>, vector<1x128xf32>
    %c0_11 = arith.constant 0 : index
    %c0_12 = arith.constant 0 : index
    %29 = vector.load %arg4[%c0_11, %c0_12] : memref<1x128xf32, #tpu.memory_space<vmem>>, vector<1x128xf32>
    %30 = vector.broadcast %28 : vector<1x128xf32> to vector<8x128xf32>
    %31 = arith.mulf %27, %30 : vector<8x128xf32>
    %32 = vector.broadcast %29 : vector<1x128xf32> to vector<8x128xf32>
    %33 = arith.addf %31, %32 : vector<8x128xf32>
    %c0_13 = arith.constant 0 : index
    %c0_14 = arith.constant 0 : index
    %34 = vector.load %arg5[%c0_13, %c0_14] : memref<8x128xf32, #tpu.memory_space<vmem>>, vector<8x128xf32>
    tpu.vector_store %arg5[%c0_13, %c0_14], %33 {strides = array<i32>} : memref<8x128xf32, #tpu.memory_space<vmem>>, vector<8x128xf32>,
    return
  }
  func.func @transform_0(%arg0: i32) -> (i32, i32) {
    %c0_i32 = arith.constant 0 : i32
    %c0_i32_0 = arith.constant 0 : i32
    return %arg0, %c0_i32 : i32, i32
  }
  func.func @transform_1(%arg0: i32) -> (i32, i32) {
    %c0_i32 = arith.constant 0 : i32
    %c0_i32_0 = arith.constant 0 : i32
    %c0_i32_1 = arith.constant 0 : i32
    return %c0_i32, %c0_i32_0 : i32, i32
  }
  func.func @transform_2(%arg0: i32) -> (i32, i32) {
    %c0_i32 = arith.constant 0 : i32
    %c0_i32_0 = arith.constant 0 : i32
    %c0_i32_1 = arith.constant 0 : i32
    return %c0_i32, %c0_i32_0 : i32, i32
  }
  func.func @transform_3(%arg0: i32) -> (i32, i32) {
    %c0_i32 = arith.constant 0 : i32
    %c0_i32_0 = arith.constant 0 : i32
    %c0_i32_1 = arith.constant 0 : i32
    return %c0_i32, %c0_i32_0 : i32, i32
  }
  func.func @transform_4(%arg0: i32) -> (i32, i32) {
    %c0_i32 = arith.constant 0 : i32
    %c0_i32_0 = arith.constant 0 : i32
    return %arg0, %c0_i32 : i32, i32
  }
}

</mosaic_0001>

<bundles_post_ra>
// kernel: tpu_custom_call.1
= control target key start
LH: loop header
LB: loop body
LE: loop exit
PB: predicated region body
PF: predicated region fallthrough
CT: control target
= control target key end

     0   :  { %9 = vsyncpa [#allocation3], 0  ;;  %s778_s0 = inlined_call_operand.vmem [shape: s32[16,1], index: 0, kind: input, shape index: {}]   ;;  %s779_s1 = inlined_call_operand.hbm [shape: f32[32,128], index: 1, kind: input, shape index: {}]   ;;  %s780_s2 = inlined_call_operand.vmem [shape: f32[1,128], index: 2, kind: input, shape index: {}]   ;;  %s781_s3 = inlined_call_operand.vmem [shape: f32[1,128], index: 3, kind: input, shape index: {}]   ;;  %s782_s4 = inlined_call_operand.hbm [shape: f32[16,128], index: 4, kind: output, shape index: {}]  }
   0x1   :  { %10 = vsyncpa [#allocation4], 0 }
   0x2   :  { %12 = vsyncpa [#allocation4 + $0x1], 0  ;;  %s637_s15 = smov 0   ;;  %s639_s16 = smov 0  }
   0x3   :  { %s641_s17 = smov 0   ;;  %s643_s18 = smov 0  }
   0x4 LB: > { %s658_s19 = sadd.s32 4294967295, %s602_s18   ;;  %s411_s20 = sadd.s32 4294967294, %s602_s18   ;;  %s602_s18 = sphi %s643_s18, %s798_s18   ;;  %s598_s17 = sphi %s641_s17, %s797_s17   ;;  %s594_s16 = sphi %s639_s16, %s796_s16   ;;  %s590_s15 = sphi %s637_s15, %s795_s15  }
   0x5   : > { %s662_s21 = sadd.s32 1, %s602_s18   ;;  %s114_s22 = sadd.s32 1, %s598_s17 }
   0x6   : > { %s111_s23 = ssub.s32 %s602_s18, %s662_s21  ;;  %p124_p0 = scmp.ne.s32.totalorder %s598_s17, %s594_s16 }
   0x7   : > { %p112_p1 = scmp.eq.s32.totalorder %s111_s23, 0  ;;  %p125_p2 = scmp.eq.s32.totalorder %s658_s19, 1 }
   0x8   : > { %p130_p3 = scmp.ne.s32.totalorder %s594_s16, %s590_s15  ;;  %p131_p4 = scmp.eq.s32.totalorder %s411_s20, 1 }
   0x9   : > { %s673_s24 = scalar_select %p112_p1, %s598_s17, %s114_s22  }
   0xa   : > { %p675_p5 = por %p125_p2, %p124_p0  ;;  %p679_p6 = por %p131_p4, %p130_p3 }
   0xb   : > { %p412_p7 = scmp.ge.s32.totalorder %s602_s18, 1  ;;  %p138_p8 = scmp.lt.s32.totalorder %s602_s18, 3 }
   0xc   : > { %s786_s25 = scalar_select %p675_p5, 1, 0 }
   0xd   : > { %s787_s26 = scalar_select %p679_p6, 1, 0 }
   0xe   : > { %p783_p9 = scmp.eq.s32.totalorder %s658_s19, 0  ;;  %p686_p10 = pnand %p412_p7, %p138_p8 }
   0xf   : > { %s604_s28 = smov [#allocation2]   ;;  %s508_s7 = scalar_lea.hbm %s779_s1, 512 }
  0x10   : > { %s788_s27 = scalar_select %p686_p10, 1, 0 }
  0x11   : > { %s150_s29 = sshll.u32 %s604_s28, 4  ;;  %p455_p11 = pneg %p686_p10  ;;  %s151_s29 = int_to_ptr.vmem [resolvable:$true] %s150_s29 }
  0x12   : > { %p509_p13 = scmp.ne.s32.totalorder %s779_s1, %s508_s7  ;;  %p515_p3 = scmp.lt.u32.totalorder %s508_s7, %s779_s1 }
  0x13   : > { %p694_p12 = pnand %p783_p9, %p455_p11 }
  0x15   : > { %p510_p0 = pneg %p694_p12 }
  0x17   : > { %p511_p1 = pnand %p510_p0, %p509_p13 }
  0x19   : > { %p512_p2 = pneg %p511_p1 }
  0x1b   : > { %p517_p4 = pnand %p515_p3, %p512_p2 }
  0x1d   : > { %520 = shalt.err (!%p517_p4)
}
  0x1e   : > { %s521_s12 = scalar_lea.vmem %s151_s29, 512  ;;  %p529_p9 = scmp.lt.s32.totalorder %s151_s29, %s151_s29 }
  0x1f   : > { %p522_p7 = scmp.ne.s32.totalorder %s151_s29, %s521_s12  ;;  %p530_p6 = scmp.lt.s32.totalorder %s521_s12, %s521_s12 }
  0x21   : > { %p524_p8 = pnand %p522_p7, %p510_p0  ;;  %p531_p5 = por %p530_p6, %p529_p9 }
  0x23   : > { %p525_p11 = pneg %p524_p8 }
  0x25   : > { %p532_p10 = pnand %p531_p5, %p525_p11 }
  0x27   : > { %535 = shalt.err (!%p532_p10)
}
  0x28   : > { %s605_s13 = smov 128   ;;  %s606_s14 = smov 8  }
  0x29   : > { %458 = dma.hbm_to_vmem [thread:$0]  (!%p694_p12), %s779_s1, 512, %s151_s29, [#allocation3], %s605_s13, %s605_s13, %s606_s14  }
  0x2a   : > { %p790_p13 = scmp.ne.s32.totalorder %s788_s27, 0 }
  0x2b   : > { %p791_p1 = scmp.eq.s32.totalorder (!%p790_p13), %s658_s19, 0 }
  0x2c   : > { %179 = sbr.rel (%p790_p13) target bundleno = 584 (0x248), region = 36 }
  0x33   : > { %581 = dma.done.wait (%p791_p1), [#allocation3], 512   ;;  %p792_p0 = pmov %p791_p1 }
  0x34   : > { %p204_p5 = scmp.lt.s32.totalorder %s658_s19, 1  ;;  %v607_v0 = vmov 0   ;;  %v608_v1 = vmov 0.0|0.0   ;;  %v211_v3 = vld [vmem:[#allocation2] sm:$0xff]  ;;  %v212_v4 = vld [vmem:[#allocation2 + $0x8] sm:$0xff]  ;;  %v213_v6 = vld [vmem:[#allocation2 + $0x10] sm:$0xff]  ;;  %v209_v10 = vlaneseq }
  0x35   : > { %583 = vsyncadd (%p792_p0), [#allocation3], 4294966784  ;;  %505 = vset.pattern.permute.xlu0 %v607_v0  ;;  %443 = vmatprep.subr.bf16.mxu0 %v608_v1  ;;  %v444_v5 = vpack.c.bf16 %v212_v4, %v211_v3  ;;  %v214_v7 = vld [vmem:[#allocation2 + $0x18] sm:$0xff]  ;;  %vm609_vm0 = vmmov 0   ;;  %v610_v8 = vmov 0.0   ;;  %vm221_vm1 = vcmask 261120  }
  0x36   : > { %s205_s23 = scalar_select %p204_p5, %s658_s19, 1  ;;  %440 = vmatprep.mubr.msk.f32.mxu0 %vm609_vm0, %v610_v8  ;;  %v447_v9 = vpack.c.bf16 %v214_v7, %v213_v6  ;;  %v210_v11 = vand.u32 127, %v209_v10  ;;  %v421_v27 = vld [vmem:[%s780_s2] ss:$0 sm:$0xff] }
  0x37   : > { %445 = vmatpush3.bf16.msra.mxu0 %v444_v5  ;;  %s201_s5 = sand.u32 1, %s594_s16   ;;  %v422_v29 = vld [vmem:[%s781_s3] ss:$0 sm:$0xff]  ;;  %s424_s11 = sshll.u32 %s658_s19, 7 }
  0x38   : > { %s418_s28 = sshll.u32 %s205_s23, 3  ;;  %446 = vmatprep.subr.bf16.mxu0 %v608_v1  ;;  %s417_s6 = sshll.u32 %s201_s5, 3 }
  0x39   : > { %s207_s27 = scalar_lea.vmem %s778_s0, %s418_s28  ;;  %s203_s12 = scalar_lea.vmem [#allocation5], %s417_s6 }
  0x3a   : > { %v208_v2 = vld [vmem:[%s207_s27] sm:$0xff]  ;;  %s340_s13 = sshll.u32 %s203_s12, 4  ;;  %s736_s22 = scalar_lea.hbm %s782_s4, %s424_s11  ;;  %s738_s13 = int_to_ptr.vmem [resolvable:$true] %s340_s13 }
  0x3b   : > { %216 = vperm.xlu0 %505, %v208_v2   ;;  %448 = vmatpush3.bf16.msra.mxu0 %v447_v9  ;;  %s327_s23 = scalar_lea.sflag [#allocation4], %s201_s5  ;;  %s536_s28 = scalar_lea.vmem %s738_s13, 128 }
  0x3c   : > { %p537_p6 = scmp.ne.s32.totalorder %s738_s13, %s536_s28  ;;  %p793_p9 = scmp.ne.s32.totalorder %s786_s25, 0 }
  0x3d   : > { %s611_s19 = smov [#allocation5]  }
  0x3e   : > { %p538_p10 = pnand %p537_p6, %p793_p9  ;;  %s540_s30 = sshll.u32 %s611_s19, 4  ;;  %s541_s30 = int_to_ptr.vmem [resolvable:$false] %s540_s30 }
  0x3f   : > { %s542_s29 = scalar_lea.vmem %s541_s30, 256  ;;  %p543_p2 = scmp.lt.s32.totalorder %s738_s13, %s541_s30 }
  0x40   : > { %p539_p12 = pneg %p538_p10  ;;  %p544_p3 = scmp.lt.s32.totalorder %s542_s29, %s536_s28 }
  0x42   : > { %p545_p4 = por %p544_p3, %p543_p2 }
  0x44   : > { %p546_p7 = pnand %p545_p4, %p539_p12 }
  0xba   : > { %v217_v12 = vpop.permute.xlu0 %216 }
  0xbb   : > { %vm218_vm2 = vcmp.eq.s32.totalorder %v210_v11, %v217_v12 }
  0xbc   : > { %v419_v13 = vsel %vm218_vm2, 1.0, %v610_v8 }
  0xbd   : > { %441 = vmatmul.mubr.msk.f32.vlgmr.msra.gmra.mrb[0].mxu0 %vm221_vm1, %v419_v13 }
 0x190   : > { %v291_v14 = vpop.f32.mrb[0].mxu0 }
 0x191   : > { %295 = vadd.xlane.f32.xlu0 %v291_v14  ;;  %v442_v15 = vpop.f32.mrb[1].mxu0  ;;  %v297_v16 = vmul.f32 %v291_v14, %v291_v14 }
 0x193   : > { %298 = vadd.xlane.f32.xlu1 %v297_v16 }
 0x21e   : > { %v296_v17 = vpop.xlane.xlu0 %295 }
 0x21f   : > { %v300_v18 = vmul.f32 0.0078125, %v296_v17 }
 0x220   : > { %v299_v19 = vpop.xlane.xlu1 %298 }
 0x221   : > { %v302_v20 = vmul.f32 %v300_v18, %v300_v18  ;;  %v301_v21 = vmul.f32 0.0078125, %v299_v19  ;;  %v305_v25 = vsub.f32 %v291_v14, %v300_v18 }
 0x223   : > { %v303_v22 = vsub.f32 %v301_v21, %v302_v20 }
 0x225   : > { %v304_v23 = vmax.f32 %v303_v22, 0.0 }
 0x227   : > { %v306_v24 = vadd.f32 1e-05, %v304_v23 }
 0x229   : > { %506 = vrsqrt.f32 %v306_v24 }
 0x233   : > { %v507_v26 = vpop.eup %506 }
 0x234   : > { %v308_v28 = vmul.f32 %v507_v26, %v305_v25 }
 0x236   : > { %v317_v30 = vmul.f32 %v421_v27, %v308_v28 }
 0x238   : > { %v324_v31 = vadd.f32 %v422_v29, %v317_v30 }
 0x23a   : > { %325 = vst [vmem:[%s203_s12] sm:$0xff] %v324_v31 }
 0x23b   : > { %549 = shalt.err (!%p546_p7)
}
 0x23c   : > { %s550_s27 = scalar_lea.hbm %s736_s22, 128  ;;  %s554_s7 = scalar_lea.hbm %s782_s4, 256 }
 0x23d   : > { %p551_p8 = scmp.ne.s32.totalorder %s736_s22, %s550_s27  ;;  %p555_p1 = scmp.lt.u32.totalorder %s736_s22, %s782_s4 }
 0x23e   : > { %p556_p0 = scmp.lt.u32.totalorder %s554_s7, %s550_s27  ;;  %p558_p6 = scmp.lt.u32.totalorder %s550_s27, %s736_s22 }
 0x23f   : > { %p552_p11 = pnand %p551_p8, %p793_p9 }
 0x240   : > { %p557_p5 = por %p556_p0, %p555_p1 }
 0x241   : > { %p553_p13 = pneg %p552_p11 }
 0x242   : > { %p559_p10 = por %p558_p6, %p557_p5 }
 0x244   : > { %p560_p12 = pnand %p559_p10, %p553_p13 }
 0x246   : > { %563 = shalt.err (!%p560_p12)
}
 0x247   : > { %453 = dma.vmem_to_hbm [thread:$0]  (%p793_p9), %s738_s13, 128, %s736_s22, %s327_s23  }
 0x248 PF: > { %p465_p2 = scmp.ge.s32.totalorder %s602_s18, 2  ;;  %s352_s10 = sand.u32 1, %s590_s15  }
 0x249   : > { %p794_p3 = scmp.ne.s32.totalorder %s787_s26, 0  ;;  %s353_s11 = scalar_lea.sflag [#allocation4], %s352_s10 }
 0x24b   : > { %p460_p4 = pnand %p465_p2, %p794_p3 }
 0x24d   : > { %585 = dma.done.wait (!%p460_p4), %s353_s11, 128  }
 0x24e   : > { %587 = vsyncadd (!%p460_p4), %s353_s11, 4294967168  ;;  %p15_p7 = scmp.ge.s32.totalorder %s662_s21, 4   ;;  %s795_s15 = smov %s594_s16 }
 0x24f   : > { %s796_s16 = smov %s598_s17  ;;  %s797_s17 = smov %s673_s24 }
 0x250   : > { %s798_s18 = smov %s662_s21  ;;  %17 = sbr.rel (!%p15_p7) target bundleno = 4 (0x4), region = 76 }
 0x257   :  { %358 = vsyncpa [#allocation3], 1 }
 0x258   :  { %360 = vsyncpa [#allocation3 + $0x1], 1 }
 0x259   :  { %361 = vsyncpa [#allocation4], 1 }
 0x25a   :  { %363 = vsyncpa [#allocation4 + $0x1], 1 }

// kernel: tpu_custom_call.1
= control target key start
LH: loop header
LB: loop body
LE: loop exit
PB: predicated region body
PF: predicated region fallthrough
CT: control target
= control target key end

     0   :  { %9 = vsyncpa [#allocation3], 0  ;;  %s778_s0 = inlined_call_operand.vmem [shape: s32[16,1], index: 0, kind: input, shape index: {}]   ;;  %s779_s1 = inlined_call_operand.hbm [shape: f32[32,128], index: 1, kind: input, shape index: {}]   ;;  %s780_s2 = inlined_call_operand.vmem [shape: f32[1,128], index: 2, kind: input, shape index: {}]   ;;  %s781_s3 = inlined_call_operand.vmem [shape: f32[1,128], index: 3, kind: input, shape index: {}]   ;;  %s782_s4 = inlined_call_operand.hbm [shape: f32[16,128], index: 4, kind: output, shape index: {}]  }
   0x1   :  { %10 = vsyncpa [#allocation4], 0 }
   0x2   :  { %12 = vsyncpa [#allocation4 + $0x1], 0  ;;  %s637_s15 = smov 0   ;;  %s639_s16 = smov 0  }
   0x3   :  { %s641_s17 = smov 0   ;;  %s643_s18 = smov 0  }
   0x4 LB: > { %s658_s19 = sadd.s32 4294967295, %s602_s18   ;;  %s411_s20 = sadd.s32 4294967294, %s602_s18   ;;  %s602_s18 = sphi %s643_s18, %s798_s18   ;;  %s598_s17 = sphi %s641_s17, %s797_s17   ;;  %s594_s16 = sphi %s639_s16, %s796_s16   ;;  %s590_s15 = sphi %s637_s15, %s795_s15  }
   0x5   : > { %s662_s21 = sadd.s32 1, %s602_s18   ;;  %s114_s22 = sadd.s32 1, %s598_s17 }
   0x6   : > { %s111_s23 = ssub.s32 %s602_s18, %s662_s21  ;;  %p124_p0 = scmp.ne.s32.totalorder %s598_s17, %s594_s16 }
   0x7   : > { %p112_p1 = scmp.eq.s32.totalorder %s111_s23, 0  ;;  %p125_p2 = scmp.eq.s32.totalorder %s658_s19, 1 }
   0x8   : > { %p130_p3 = scmp.ne.s32.totalorder %s594_s16, %s590_s15  ;;  %p131_p4 = scmp.eq.s32.totalorder %s411_s20, 1 }
   0x9   : > { %s673_s24 = scalar_select %p112_p1, %s598_s17, %s114_s22  }
   0xa   : > { %p675_p5 = por %p125_p2, %p124_p0  ;;  %p679_p6 = por %p131_p4, %p130_p3 }
   0xb   : > { %p412_p7 = scmp.ge.s32.totalorder %s602_s18, 1  ;;  %p138_p8 = scmp.lt.s32.totalorder %s602_s18, 3 }
   0xc   : > { %s786_s25 = scalar_select %p675_p5, 1, 0 }
   0xd   : > { %s787_s26 = scalar_select %p679_p6, 1, 0 }
   0xe   : > { %p783_p9 = scmp.eq.s32.totalorder %s658_s19, 0  ;;  %p686_p10 = pnand %p412_p7, %p138_p8 }
   0xf   : > { %s604_s28 = smov [#allocation2]   ;;  %s508_s7 = scalar_lea.hbm %s779_s1, 512 }
  0x10   : > { %s788_s27 = scalar_select %p686_p10, 1, 0 }
  0x11   : > { %s150_s29 = sshll.u32 %s604_s28, 4  ;;  %p455_p11 = pneg %p686_p10  ;;  %s151_s29 = int_to_ptr.vmem [resolvable:$true] %s150_s29 }
  0x12   : > { %p509_p13 = scmp.ne.s32.totalorder %s779_s1, %s508_s7  ;;  %p515_p3 = scmp.lt.u32.totalorder %s508_s7, %s779_s1 }
  0x13   : > { %p694_p12 = pnand %p783_p9, %p455_p11 }
  0x15   : > { %p510_p0 = pneg %p694_p12 }
  0x17   : > { %p511_p1 = pnand %p510_p0, %p509_p13 }
  0x19   : > { %p512_p2 = pneg %p511_p1 }
  0x1b   : > { %p517_p4 = pnand %p515_p3, %p512_p2 }
  0x1d   : > { %520 = shalt.err (!%p517_p4)
}
  0x1e   : > { %s521_s12 = scalar_lea.vmem %s151_s29, 512  ;;  %p529_p9 = scmp.lt.s32.totalorder %s151_s29, %s151_s29 }
  0x1f   : > { %p522_p7 = scmp.ne.s32.totalorder %s151_s29, %s521_s12  ;;  %p530_p6 = scmp.lt.s32.totalorder %s521_s12, %s521_s12 }
  0x21   : > { %p524_p8 = pnand %p522_p7, %p510_p0  ;;  %p531_p5 = por %p530_p6, %p529_p9 }
  0x23   : > { %p525_p11 = pneg %p524_p8 }
  0x25   : > { %p532_p10 = pnand %p531_p5, %p525_p11 }
  0x27   : > { %535 = shalt.err (!%p532_p10)
}
  0x28   : > { %s605_s13 = smov 128   ;;  %s606_s14 = smov 8  }
  0x29   : > { %458 = dma.hbm_to_vmem [thread:$0]  (!%p694_p12), %s779_s1, 512, %s151_s29, [#allocation3], %s605_s13, %s605_s13, %s606_s14  }
  0x2a   : > { %p790_p13 = scmp.ne.s32.totalorder %s788_s27, 0 }
  0x2b   : > { %p791_p1 = scmp.eq.s32.totalorder (!%p790_p13), %s658_s19, 0 }
  0x2c   : > { %179 = sbr.rel (%p790_p13) target bundleno = 584 (0x248), region = 36 }
  0x33   : > { %581 = dma.done.wait (%p791_p1), [#allocation3], 512   ;;  %p792_p0 = pmov %p791_p1 }
  0x34   : > { %p204_p5 = scmp.lt.s32.totalorder %s658_s19, 1  ;;  %v607_v0 = vmov 0   ;;  %v608_v1 = vmov 0.0|0.0   ;;  %v211_v3 = vld [vmem:[#allocation2] sm:$0xff]  ;;  %v212_v4 = vld [vmem:[#allocation2 + $0x8] sm:$0xff]  ;;  %v213_v6 = vld [vmem:[#allocation2 + $0x10] sm:$0xff]  ;;  %v209_v10 = vlaneseq }
  0x35   : > { %583 = vsyncadd (%p792_p0), [#allocation3], 4294966784  ;;  %505 = vset.pattern.permute.xlu0 %v607_v0  ;;  %443 = vmatprep.subr.bf16.mxu0 %v608_v1  ;;  %v444_v5 = vpack.c.bf16 %v212_v4, %v211_v3  ;;  %v214_v7 = vld [vmem:[#allocation2 + $0x18] sm:$0xff]  ;;  %vm609_vm0 = vmmov 0   ;;  %v610_v8 = vmov 0.0   ;;  %vm221_vm1 = vcmask 261120  }
  0x36   : > { %s205_s23 = scalar_select %p204_p5, %s658_s19, 1  ;;  %440 = vmatprep.mubr.msk.f32.mxu0 %vm609_vm0, %v610_v8  ;;  %v447_v9 = vpack.c.bf16 %v214_v7, %v213_v6  ;;  %v210_v11 = vand.u32 127, %v209_v10  ;;  %v421_v27 = vld [vmem:[%s780_s2] ss:$0 sm:$0xff] }
  0x37   : > { %445 = vmatpush3.bf16.msra.mxu0 %v444_v5  ;;  %s201_s5 = sand.u32 1, %s594_s16   ;;  %v422_v29 = vld [vmem:[%s781_s3] ss:$0 sm:$0xff]  ;;  %s424_s11 = sshll.u32 %s658_s19, 7 }
  0x38   : > { %s418_s28 = sshll.u32 %s205_s23, 3  ;;  %446 = vmatprep.subr.bf16.mxu0 %v608_v1  ;;  %s417_s6 = sshll.u32 %s201_s5, 3 }
  0x39   : > { %s207_s27 = scalar_lea.vmem %s778_s0, %s418_s28  ;;  %s203_s12 = scalar_lea.vmem [#allocation5], %s417_s6 }
  0x3a   : > { %v208_v2 = vld [vmem:[%s207_s27] sm:$0xff]  ;;  %s340_s13 = sshll.u32 %s203_s12, 4  ;;  %s736_s22 = scalar_lea.hbm %s782_s4, %s424_s11  ;;  %s738_s13 = int_to_ptr.vmem [resolvable:$true] %s340_s13 }
  0x3b   : > { %216 = vperm.xlu0 %505, %v208_v2   ;;  %448 = vmatpush3.bf16.msra.mxu0 %v447_v9  ;;  %s327_s23 = scalar_lea.sflag [#allocation4], %s201_s5  ;;  %s536_s28 = scalar_lea.vmem %s738_s13, 128 }
  0x3c   : > { %p537_p6 = scmp.ne.s32.totalorder %s738_s13, %s536_s28  ;;  %p793_p9 = scmp.ne.s32.totalorder %s786_s25, 0 }
  0x3d   : > { %s611_s19 = smov [#allocation5]  }
  0x3e   : > { %p538_p10 = pnand %p537_p6, %p793_p9  ;;  %s540_s30 = sshll.u32 %s611_s19, 4  ;;  %s541_s30 = int_to_ptr.vmem [resolvable:$false] %s540_s30 }
  0x3f   : > { %s542_s29 = scalar_lea.vmem %s541_s30, 256  ;;  %p543_p2 = scmp.lt.s32.totalorder %s738_s13, %s541_s30 }
  0x40   : > { %p539_p12 = pneg %p538_p10  ;;  %p544_p3 = scmp.lt.s32.totalorder %s542_s29, %s536_s28 }
  0x42   : > { %p545_p4 = por %p544_p3, %p543_p2 }
  0x44   : > { %p546_p7 = pnand %p545_p4, %p539_p12 }
  0xba   : > { %v217_v12 = vpop.permute.xlu0 %216 }
  0xbb   : > { %vm218_vm2 = vcmp.eq.s32.totalorder %v210_v11, %v217_v12 }
  0xbc   : > { %v419_v13 = vsel %vm218_vm2, 1.0, %v610_v8 }
  0xbd   : > { %441 = vmatmul.mubr.msk.f32.vlgmr.msra.gmra.mrb[0].mxu0 %vm221_vm1, %v419_v13 }
 0x190   : > { %v291_v14 = vpop.f32.mrb[0].mxu0 }
 0x191   : > { %295 = vadd.xlane.f32.xlu0 %v291_v14  ;;  %v442_v15 = vpop.f32.mrb[1].mxu0  ;;  %v297_v16 = vmul.f32 %v291_v14, %v291_v14 }
 0x193   : > { %298 = vadd.xlane.f32.xlu1 %v297_v16 }
 0x21e   : > { %v296_v17 = vpop.xlane.xlu0 %295 }
 0x21f   : > { %v300_v18 = vmul.f32 0.0078125, %v296_v17 }
 0x220   : > { %v299_v19 = vpop.xlane.xlu1 %298 }
 0x221   : > { %v302_v20 = vmul.f32 %v300_v18, %v300_v18  ;;  %v301_v21 = vmul.f32 0.0078125, %v299_v19  ;;  %v305_v25 = vsub.f32 %v291_v14, %v300_v18 }
 0x223   : > { %v303_v22 = vsub.f32 %v301_v21, %v302_v20 }
 0x225   : > { %v304_v23 = vmax.f32 %v303_v22, 0.0 }
 0x227   : > { %v306_v24 = vadd.f32 1e-05, %v304_v23 }
 0x229   : > { %506 = vrsqrt.f32 %v306_v24 }
 0x233   : > { %v507_v26 = vpop.eup %506 }
 0x234   : > { %v308_v28 = vmul.f32 %v507_v26, %v305_v25 }
 0x236   : > { %v317_v30 = vmul.f32 %v421_v27, %v308_v28 }
 0x238   : > { %v324_v31 = vadd.f32 %v422_v29, %v317_v30 }
 0x23a   : > { %325 = vst [vmem:[%s203_s12] sm:$0xff] %v324_v31 }
 0x23b   : > { %549 = shalt.err (!%p546_p7)
}
 0x23c   : > { %s550_s27 = scalar_lea.hbm %s736_s22, 128  ;;  %s554_s7 = scalar_lea.hbm %s782_s4, 256 }
 0x23d   : > { %p551_p8 = scmp.ne.s32.totalorder %s736_s22, %s550_s27  ;;  %p555_p1 = scmp.lt.u32.totalorder %s736_s22, %s782_s4 }
 0x23e   : > { %p556_p0 = scmp.lt.u32.totalorder %s554_s7, %s550_s27  ;;  %p558_p6 = scmp.lt.u32.totalorder %s550_s27, %s736_s22 }
 0x23f   : > { %p552_p11 = pnand %p551_p8, %p793_p9 }
 0x240   : > { %p557_p5 = por %p556_p0, %p555_p1 }
 0x241   : > { %p553_p13 = pneg %p552_p11 }
 0x242   : > { %p559_p10 = por %p558_p6, %p557_p5 }
 0x244   : > { %p560_p12 = pnand %p559_p10, %p553_p13 }
 0x246   : > { %563 = shalt.err (!%p560_p12)
}
 0x247   : > { %453 = dma.vmem_to_hbm [thread:$0]  (%p793_p9), %s738_s13, 128, %s736_s22, %s327_s23  }
 0x248 PF: > { %p465_p2 = scmp.ge.s32.totalorder %s602_s18, 2  ;;  %s352_s10 = sand.u32 1, %s590_s15  }
 0x249   : > { %p794_p3 = scmp.ne.s32.totalorder %s787_s26, 0  ;;  %s353_s11 = scalar_lea.sflag [#allocation4], %s352_s10 }
 0x24b   : > { %p460_p4 = pnand %p465_p2, %p794_p3 }
 0x24d   : > { %585 = dma.done.wait (!%p460_p4), %s353_s11, 128  }
 0x24e   : > { %587 = vsyncadd (!%p460_p4), %s353_s11, 4294967168  ;;  %p15_p7 = scmp.ge.s32.totalorder %s662_s21, 4   ;;  %s795_s15 = smov %s594_s16 }
 0x24f   : > { %s796_s16 = smov %s598_s17  ;;  %s797_s17 = smov %s673_s24 }
 0x250   : > { %s798_s18 = smov %s662_s21  ;;  %17 = sbr.rel (!%p15_p7) target bundleno = 4 (0x4), region = 76 }
 0x257   :  { %358 = vsyncpa [#allocation3], 1 }
 0x258   :  { %360 = vsyncpa [#allocation3 + $0x1], 1 }
 0x259   :  { %361 = vsyncpa [#allocation4], 1 }
 0x25a   :  { %363 = vsyncpa [#allocation4 + $0x1], 1 }

</bundles_post_ra>
